<compile_context>
chip_gen: v7x
topology: tpu7x:2x2x1
jax: 0.10.0
libtpu: 0.0.40
codegen_flags: <defaults>
</compile_context>

<pallas_src>
import functools
import math

import jax
import jax.numpy as jnp
from jax import lax
from jax.experimental import pallas as pl
from jax.experimental.pallas import tpu as pltpu


def _round_up(v, m):
    return (v + m - 1) // m * m


def _pick_tb(batch, nc):
    """Samples per grid step: fill >=256 MXU rows, keep rows % 8 == 0, >=2 steps."""
    g = 8 // math.gcd(nc, 8)                       # TB granule so (TB*nc) % 8 == 0
    tb = _round_up(max(1, (256 + nc - 1) // nc), g)  # fill the 256-row MXU (v6e/v7x)
    if batch > g:                                  # keep >=2 grid steps (v7x: 2 TCs)
        tb = min(tb, max(g, _round_up(batch // 2, g)))
    return min(tb, _round_up(max(batch, 1), g))


def prepare_weight(w, num_classes):
    """Conv2d(D, NC, 1) weight -> (D, 128-padded NC) bf16, done once, not per call."""
    w2 = w.reshape(num_classes, -1)
    d = w2.shape[-1]
    ncp = _round_up(num_classes, 128)
    return (jnp.zeros((d, ncp), jnp.bfloat16)
            .at[:, :num_classes].set(w2.T.astype(jnp.bfloat16)))


# ----------------------------------------------------------------------------
# Pallas kernel: TB samples (rows = TB * num_classes) per grid step
# ----------------------------------------------------------------------------

def _predictor_kernel(x_ref, w_ref, meta_ref, o_ref, *, nc, ncp, rows):
    x = x_ref[...]                                   # (rows, D)   bf16
    w = w_ref[...]                                   # (D, ncp)    bf16 (resident)
    logits = jnp.dot(x, w, preferred_element_type=jnp.float32)   # (rows, ncp) f32

    meta = meta_ref[...]                             # (rows, 2)   f32
    tgt = meta[:, 0:1]                               # target class, -1 if inactive row
    wgt = meta[:, 1:2]                               # mask / per-sample active count

    col = lax.broadcasted_iota(jnp.int32, (rows, ncp), 1)   # built once per step
    colf = col.astype(jnp.float32)
    z = jnp.where(col < nc, logits, -1e30)           # mask padded class lanes

    zmax = jnp.max(z, axis=-1, keepdims=True)                               # (rows, 1)
    lse = zmax + jnp.log(jnp.sum(jnp.exp(z - zmax), axis=-1, keepdims=True))
    tgt_logit = jnp.sum(jnp.where(colf == tgt, z, 0.0), axis=-1, keepdims=True)
    ce = lse - tgt_logit                                                    # (rows, 1)

    # First-occurrence argmax (matches torch.argmax tie-breaking).
    pred = jnp.min(jnp.where(z == zmax, colf, float(ncp)), axis=-1, keepdims=True)
    mask = (tgt >= 0.0).astype(jnp.float32)
    correct = (pred == tgt).astype(jnp.float32) * mask                      # (rows, 1)

    loss_p = jnp.sum(ce * wgt, axis=0, keepdims=True)   # sum_i mean_CE_i (partial)
    acc_p = jnp.sum(correct, axis=0, keepdims=True)     # #correct (partial)
    cnt_p = jnp.sum(mask, axis=0, keepdims=True)        # #active  (partial)

    ocol = lax.broadcasted_iota(jnp.int32, (1, 128), 1)
    o_ref[0] = (jnp.where(ocol == 0, loss_p, 0.0)
                + jnp.where(ocol == 1, acc_p, 0.0)
                + jnp.where(ocol == 2, cnt_p, 0.0))      # (1, 128) lane-dense stats


# ----------------------------------------------------------------------------
# Wrapper
# ----------------------------------------------------------------------------

def class_predictor_forward(x, label, w_pad, *, num_classes, tb):
    """Matches Class_Predictor.forward(x, label) -> (loss / batch_size, acc / num)."""
    B = x.shape[0]
    nc = num_classes
    x3 = x.reshape(B, nc, -1)
    D = x3.shape[-1]
    ncp = w_pad.shape[-1]

    B_pad = _round_up(B, tb)
    G = B_pad // tb
    rows = tb * nc

    if B_pad != B:                                    # padded samples: all-zero labels
        x3 = jnp.concatenate([x3, jnp.zeros((B_pad - B, nc, D), x3.dtype)], axis=0)
        label = jnp.concatenate(
            [label, jnp.zeros((B_pad - B, nc), label.dtype)], axis=0)

    x_flat = x3.reshape(B_pad * nc, D).astype(jnp.bfloat16)   # fuses under jit

    mask = (label > 0).astype(jnp.float32)                    # (B_pad, nc)
    cnt = jnp.sum(mask, axis=1, keepdims=True)                # (B_pad, 1)
    wgt = jnp.where(cnt > 0, mask / jnp.maximum(cnt, 1.0), 0.0)
    tgt = jnp.where(mask > 0, jnp.arange(nc, dtype=jnp.float32)[None, :], -1.0)
    meta = jnp.stack([tgt, wgt], axis=-1).reshape(B_pad * nc, 2)

    kernel = functools.partial(_predictor_kernel, nc=nc, ncp=ncp, rows=rows)
    stats = pl.pallas_call(
        kernel,
        out_shape=jax.ShapeDtypeStruct((G, 1, 128), jnp.float32),
        grid=(G,),
        in_specs=[
            pl.BlockSpec((rows, D), lambda b: (b, 0)),        # per-step x rows
            pl.BlockSpec((D, ncp), lambda b: (0, 0)),         # resident weight
            pl.BlockSpec((rows, 2), lambda b: (b, 0)),        # per-row target / weight
        ],
        out_specs=pl.BlockSpec((1, 1, 128), lambda b: (b, 0, 0)),
        compiler_params=pltpu.CompilerParams(
            dimension_semantics=("parallel",)),
    )(x_flat, w_pad, meta)

    loss = jnp.sum(stats[:, 0, 0]) / B
    num = jnp.sum(stats[:, 0, 2])
    acc = jnp.sum(stats[:, 0, 1]) / num
    return loss, acc


# ----------------------------------------------------------------------------
# Pure-JAX reference (same bf16 operand rounding, f32 math) for self-check
# ----------------------------------------------------------------------------

def _reference_forward(x, label, w, *, num_classes):
    B = x.shape[0]
    x3 = x.reshape(B, num_classes, -1).astype(jnp.bfloat16).astype(jnp.float32)
    w2 = w.reshape(num_classes, -1).astype(jnp.bfloat16).astype(jnp.float32)
    logits = jnp.einsum('bcd,kd->bck', x3, w2)                 # (B, NC, NC)
    mask = (label > 0).astype(jnp.float32)
    zmax = jnp.max(logits, axis=-1, keepdims=True)
    lse = (zmax + jnp.log(jnp.sum(jnp.exp(logits - zmax), axis=-1, keepdims=True)))[..., 0]
    tgt = jnp.einsum('bcc->bc', logits)
    ce = lse - tgt
    cnt = jnp.sum(mask, axis=1)
    loss_i = jnp.where(cnt > 0, jnp.sum(ce * mask, axis=1) / jnp.maximum(cnt, 1.0), 0.0)
    loss = jnp.sum(loss_i) / B
    pred = jnp.argmax(logits, axis=-1)
    correct = (pred == jnp.arange(num_classes)[None, :]).astype(jnp.float32) * mask
    acc = jnp.sum(correct) / jnp.sum(mask)
    return loss, acc


if __name__ == "__main__":
    key = jax.random.PRNGKey(0)
    B, NC, D = 4, 20, 256                    # small: batch=4, num_classes=20, rep_size=256
    kx, kl, kw, ki = jax.random.split(key, 4)

    x = jax.random.normal(kx, (B, NC, D), dtype=jnp.float32)
    label = (jax.random.uniform(kl, (B, NC)) < 0.3).astype(jnp.float32)
    # guarantee at least one active class per sample so acc's denominator is > 0
    label = label.at[jnp.arange(B), jax.random.randint(ki, (B,), 0, NC)].set(1.0)
    w = 0.05 * jax.random.normal(kw, (NC, D), dtype=jnp.float32)   # Conv2d(D, NC, 1, bias=False)

    tb = _pick_tb(B, NC)                      # 2 samples/step -> 40-row tiles, 2 grid steps
    w_pad = prepare_weight(w, NC)             # hoisted out of the per-call path
    fwd = jax.jit(functools.partial(class_predictor_forward, num_classes=NC, tb=tb))
    loss, acc = jax.block_until_ready(fwd(x, label, w_pad))

    ref_loss, ref_acc = _reference_forward(x, label, w, num_classes=NC)
    assert loss.shape == () and acc.shape == (), (loss.shape, acc.shape)
    assert bool(jnp.isfinite(loss)) and bool(jnp.isfinite(acc))
    assert bool(jnp.allclose(loss, ref_loss, rtol=2e-3, atol=2e-3)), (loss, ref_loss)
    assert bool(jnp.allclose(acc, ref_acc, rtol=1e-3, atol=1e-3)), (acc, ref_acc)
    print("KERNEL_OK")
</pallas_src>

<mosaic_0001>
module attributes {stable_mosaic.version = 11 : i64} {
  func.func @_predictor_kernel(%arg0: i32, %arg1: memref<40x256xbf16, #tpu.memory_space<vmem>>, %arg2: memref<256x128xbf16, #tpu.memory_space<vmem>>, %arg3: memref<40x2xf32, #tpu.memory_space<vmem>>, %arg4: memref<1x1x128xf32, #tpu.memory_space<vmem>>) attributes {dimension_semantics = [#tpu.dimension_semantics<parallel>], iteration_bounds = array<i64: 2>, scalar_prefetch = 0 : i64, scratch_operands = 0 : i64, tpu.core_type = #tpu.core_type<tc>, window_params = [{transform_indices = @transform_0, window_bounds = array<i64: 40, 256>}, {pipeline_mode = #tpu.pipeline_mode<synchronous>, transform_indices = @transform_1, window_bounds = array<i64: 256, 128>}, {transform_indices = @transform_2, window_bounds = array<i64: 40, 2>}, {transform_indices = @transform_3, window_bounds = array<i64: 1, 1, 128>}]} {
    %c0 = arith.constant 0 : index
    %c0_0 = arith.constant 0 : index
    %0 = vector.load %arg1[%c0, %c0_0] : memref<40x256xbf16, #tpu.memory_space<vmem>>, vector<40x256xbf16>
    %c0_1 = arith.constant 0 : index
    %c0_2 = arith.constant 0 : index
    %1 = vector.load %arg2[%c0_1, %c0_2] : memref<256x128xbf16, #tpu.memory_space<vmem>>, vector<256x128xbf16>
    %cst = arith.constant dense<0.000000e+00> : vector<40x128xf32>
    %2 = tpu.matmul %0, %1, %cst {dimension_numbers = #tpu.dot_dimension_numbers<[1], [0], [0], [1], [0, 0, 1, 1], [], []>} : vector<40x256xbf16>, vector<256x128xbf16>, vector<40x128xf32> -> vector<40x128xf32>
    %c0_3 = arith.constant 0 : index
    %c0_4 = arith.constant 0 : index
    %3 = vector.load %arg3[%c0_3, %c0_4] : memref<40x2xf32, #tpu.memory_space<vmem>>, vector<40x2xf32>
    %4 = vector.extract_strided_slice %3 {offsets = [0, 0], sizes = [40, 1], strides = [1, 1]} : vector<40x2xf32> to vector<40x1xf32>
    %5 = vector.extract_strided_slice %3 {offsets = [0, 1], sizes = [40, 1], strides = [1, 1]} : vector<40x2xf32> to vector<40x1xf32>
    %6 = tpu.iota {dimensions = array<i32: 1>} : vector<40x128xi32>
    %7 = arith.sitofp %6 : vector<40x128xi32> to vector<40x128xf32>
    %c20_i32 = arith.constant 20 : i32
    %8 = vector.broadcast %c20_i32 : i32 to vector<40x128xi32>
    %9 = arith.cmpi slt, %6, %8 : vector<40x128xi32>
    %cst_5 = arith.constant -1.000000e+30 : f32
    %10 = vector.broadcast %cst_5 : f32 to vector<40x128xf32>
    %11 = arith.select %9, %2, %10 : vector<40x128xi1>, vector<40x128xf32>
    %cst_6 = arith.constant dense<0xFF800000> : vector<40xf32>
    %12 = vector.multi_reduction <maximumf>, %11, %cst_6 [1] : vector<40x128xf32> to vector<40xf32>
    %13 = vector.shape_cast %12 : vector<40xf32> to vector<40x1xf32>
    %14 = vector.broadcast %13 : vector<40x1xf32> to vector<40x128xf32>
    %15 = arith.subf %11, %14 : vector<40x128xf32>
    %16 = math.exp %15 : vector<40x128xf32>
    %cst_7 = arith.constant dense<0.000000e+00> : vector<40xf32>
    %17 = vector.multi_reduction <add>, %16, %cst_7 [1] : vector<40x128xf32> to vector<40xf32>
    %18 = vector.shape_cast %17 : vector<40xf32> to vector<40x1xf32>
    %19 = math.log %18 : vector<40x1xf32>
    %20 = arith.addf %13, %19 : vector<40x1xf32>
    %21 = vector.broadcast %4 : vector<40x1xf32> to vector<40x128xf32>
    %22 = arith.cmpf oeq, %7, %21 : vector<40x128xf32>
    %cst_8 = arith.constant 0.000000e+00 : f32
    %23 = vector.broadcast %cst_8 : f32 to vector<40x128xf32>
    %24 = arith.select %22, %11, %23 : vector<40x128xi1>, vector<40x128xf32>
    %cst_9 = arith.constant dense<0.000000e+00> : vector<40xf32>
    %25 = vector.multi_reduction <add>, %24, %cst_9 [1] : vector<40x128xf32> to vector<40xf32>
    %26 = vector.shape_cast %25 : vector<40xf32> to vector<40x1xf32>
    %27 = arith.subf %20, %26 : vector<40x1xf32>
    %28 = vector.broadcast %13 : vector<40x1xf32> to vector<40x128xf32>
    %29 = arith.cmpf oeq, %11, %28 : vector<40x128xf32>
    %cst_10 = arith.constant 1.280000e+02 : f32
    %30 = vector.broadcast %cst_10 : f32 to vector<40x128xf32>
    %31 = arith.select %29, %7, %30 : vector<40x128xi1>, vector<40x128xf32>
    %cst_11 = arith.constant dense<0x7F800000> : vector<40xf32>
    %32 = vector.multi_reduction <minimumf>, %31, %cst_11 [1] : vector<40x128xf32> to vector<40xf32>
    %33 = vector.shape_cast %32 : vector<40xf32> to vector<40x1xf32>
    %cst_12 = arith.constant 0.000000e+00 : f32
    %34 = vector.broadcast %cst_12 : f32 to vector<40x1xf32>
    %35 = arith.cmpf oge, %4, %34 : vector<40x1xf32>
    %36 = arith.extui %35 : vector<40x1xi1> to vector<40x1xi32>
    %37 = arith.sitofp %36 : vector<40x1xi32> to vector<40x1xf32>
    %38 = arith.cmpf oeq, %33, %4 : vector<40x1xf32>
    %39 = arith.extui %38 : vector<40x1xi1> to vector<40x1xi32>
    %40 = arith.sitofp %39 : vector<40x1xi32> to vector<40x1xf32>
    %41 = arith.mulf %40, %37 : vector<40x1xf32>
    %42 = arith.mulf %27, %5 : vector<40x1xf32>
    %cst_13 = arith.constant dense<0.000000e+00> : vector<1xf32>
    %43 = vector.multi_reduction <add>, %42, %cst_13 [0] : vector<40x1xf32> to vector<1xf32>
    %44 = vector.shape_cast %43 : vector<1xf32> to vector<1x1xf32>
    %cst_14 = arith.constant dense<0.000000e+00> : vector<1xf32>
    %45 = vector.multi_reduction <add>, %41, %cst_14 [0] : vector<40x1xf32> to vector<1xf32>
    %46 = vector.shape_cast %45 : vector<1xf32> to vector<1x1xf32>
    %cst_15 = arith.constant dense<0.000000e+00> : vector<1xf32>
    %47 = vector.multi_reduction <add>, %37, %cst_15 [0] : vector<40x1xf32> to vector<1xf32>
    %48 = vector.shape_cast %47 : vector<1xf32> to vector<1x1xf32>
    %49 = tpu.iota {dimensions = array<i32: 1>} : vector<1x128xi32>
    %c0_i32 = arith.constant 0 : i32
    %50 = vector.broadcast %c0_i32 : i32 to vector<1x128xi32>
    %51 = arith.cmpi eq, %49, %50 : vector<1x128xi32>
    %cst_16 = arith.constant 0.000000e+00 : f32
    %52 = vector.shape_cast %44 : vector<1x1xf32> to vector<1x1xf32>
    %53 = vector.broadcast %52 : vector<1x1xf32> to vector<1x128xf32>
    %54 = vector.broadcast %cst_16 : f32 to vector<1x128xf32>
    %55 = arith.select %51, %53, %54 : vector<1x128xi1>, vector<1x128xf32>
    %c1_i32 = arith.constant 1 : i32
    %56 = vector.broadcast %c1_i32 : i32 to vector<1x128xi32>
    %57 = arith.cmpi eq, %49, %56 : vector<1x128xi32>
    %cst_17 = arith.constant 0.000000e+00 : f32
    %58 = vector.shape_cast %46 : vector<1x1xf32> to vector<1x1xf32>
    %59 = vector.broadcast %58 : vector<1x1xf32> to vector<1x128xf32>
    %60 = vector.broadcast %cst_17 : f32 to vector<1x128xf32>
    %61 = arith.select %57, %59, %60 : vector<1x128xi1>, vector<1x128xf32>
    %62 = arith.addf %55, %61 : vector<1x128xf32>
    %c2_i32 = arith.constant 2 : i32
    %63 = vector.broadcast %c2_i32 : i32 to vector<1x128xi32>
    %64 = arith.cmpi eq, %49, %63 : vector<1x128xi32>
    %cst_18 = arith.constant 0.000000e+00 : f32
    %65 = vector.shape_cast %48 : vector<1x1xf32> to vector<1x1xf32>
    %66 = vector.broadcast %65 : vector<1x1xf32> to vector<1x128xf32>
    %67 = vector.broadcast %cst_18 : f32 to vector<1x128xf32>
    %68 = arith.select %64, %66, %67 : vector<1x128xi1>, vector<1x128xf32>
    %69 = arith.addf %62, %68 : vector<1x128xf32>
    %c0_19 = arith.constant 0 : index
    %c0_20 = arith.constant 0 : index
    %c0_21 = arith.constant 0 : index
    %70 = vector.load %arg4[%c0_19, %c0_20, %c0_21] : memref<1x1x128xf32, #tpu.memory_space<vmem>>, vector<1x1x128xf32>
    %71 = vector.shape_cast %70 : vector<1x1x128xf32> to vector<1x128xf32>
    %72 = vector.shape_cast %69 : vector<1x128xf32> to vector<1x1x128xf32>
    tpu.vector_store %arg4[%c0_19, %c0_20, %c0_21], %72 {strides = array<i32>} : memref<1x1x128xf32, #tpu.memory_space<vmem>>, vector<1x1x128xf32>,
    return
  }
  func.func @transform_0(%arg0: i32) -> (i32, i32) {
    %c0_i32 = arith.constant 0 : i32
    %c0_i32_0 = arith.constant 0 : i32
    return %arg0, %c0_i32 : i32, i32
  }
  func.func @transform_1(%arg0: i32) -> (i32, i32) {
    %c0_i32 = arith.constant 0 : i32
    %c0_i32_0 = arith.constant 0 : i32
    %c0_i32_1 = arith.constant 0 : i32
    return %c0_i32, %c0_i32_0 : i32, i32
  }
  func.func @transform_2(%arg0: i32) -> (i32, i32) {
    %c0_i32 = arith.constant 0 : i32
    %c0_i32_0 = arith.constant 0 : i32
    return %arg0, %c0_i32 : i32, i32
  }
  func.func @transform_3(%arg0: i32) -> (i32, i32, i32) {
    %c0_i32 = arith.constant 0 : i32
    %c0_i32_0 = arith.constant 0 : i32
    %c0_i32_1 = arith.constant 0 : i32
    return %arg0, %c0_i32, %c0_i32_0 : i32, i32, i32
  }
}

</mosaic_0001>

<bundles_post_ra>
// kernel: class_predictor_forward.1
= control target key start
LH: loop header
LB: loop body
LE: loop exit
PB: predicated region body
PF: predicated region fallthrough
CT: control target
= control target key end

     0   :  { %s898_s12 = smov 0   ;;  %s1104_s0 = inlined_call_operand.vmem [shape: bf16[80,256], index: 0, kind: input, shape index: {}]   ;;  %s1105_s1 = inlined_call_operand.vmem [shape: bf16[256,128], index: 1, kind: input, shape index: {}]   ;;  %s1106_s2 = inlined_call_operand.vmem [shape: f32[80,2], index: 2, kind: input, shape index: {}]   ;;  %s1107_s3 = inlined_call_operand.vmem [shape: f32[2,1,128], index: 3, kind: output, shape index: {}]  }
   0x1 LB: > { %s904_s13 = sadd.s32 4294967295, %s873_s12   ;;  %p719_p0 = scmp.ge.s32.totalorder %s873_s12, 1  ;;  %s873_s12 = sphi %s898_s12, %s13_s12  }
   0x2   : > { %p150_p1 = scmp.lt.s32.totalorder %s873_s12, 3 }
   0x4   : > { %p151_p2 = pnand %p719_p0, %p150_p1 }
   0x5   : > { %v823_v0 = vld [vmem:[%s1105_s1 + $0x40] sm:$0xff] (!%p151_p2)   ;;  %s178_s16 = smul.u32 (!%p151_p2), 5, %s904_s13  ;;  %v825_v2 = vld [vmem:[%s1105_s1 + $0x48] sm:$0xff] (!%p151_p2)   ;;  %v827_v4 = vld [vmem:[%s1105_s1 + $0x50] sm:$0xff] (!%p151_p2)   ;;  %v875_v5 = vmov (!%p151_p2), 0   ;;  %v416_v25 = vlaneseq (!%p151_p2)  ;;  %vm601_vm13 = vcmask (!%p151_p2), 7168  }
   0x6   : > { %154 = sbr.rel (%p151_p2) target bundleno = 741 (0x2e5), region = 32  ;;  %v824_v1 = vld [vmem:[%s1105_s1] sm:$0xff] (!%p151_p2)   ;;  %758 = vmatprep.subr.bf16.mxu0 (!%p151_p2), %v823_v0  ;;  %792 = vmatprep.subr.bf16.mxu1 (!%p151_p2), %v823_v0  ;;  %v826_v3 = vld [vmem:[%s1105_s1 + $0x8] sm:$0xff] (!%p151_p2)   ;;  %v828_v6 = vld [vmem:[%s1105_s1 + $0x10] sm:$0xff] (!%p151_p2)   ;;  %p191_p4 = scmp.lt.s32.totalorder (!%p151_p2), %s904_s13, 1 }
   0x7   : > { %759 = vmatpush3.bf16.msra.mxu0 (!%p151_p2), %v824_v1  ;;  %800 = vmatpush3.bf16.msra.mxu1 (!%p151_p2), %v824_v1  ;;  %p179_p3 = scmp.lt.s32.totalorder (!%p151_p2), %s178_s16, 9  ;;  %v829_v7 = vld [vmem:[%s1105_s1 + $0x58] sm:$0xff] (!%p151_p2)   ;;  %v831_v9 = vld [vmem:[%s1105_s1 + $0x60] sm:$0xff] (!%p151_p2)   ;;  %v833_v11 = vld [vmem:[%s1105_s1 + $0x68] sm:$0xff] (!%p151_p2)   ;;  %v978_v26 = vand.u32 (!%p151_p2), 127, %v416_v25 }
   0x8   : > { %760 = vmatprep.subr.bf16.mxu0 (!%p151_p2), %v825_v2  ;;  %793 = vmatprep.subr.bf16.mxu1 (!%p151_p2), %v825_v2  ;;  %v830_v8 = vld [vmem:[%s1105_s1 + $0x18] sm:$0xff] (!%p151_p2)   ;;  %v832_v10 = vld [vmem:[%s1105_s1 + $0x20] sm:$0xff] (!%p151_p2)   ;;  %v834_v14 = vld [vmem:[%s1105_s1 + $0x28] sm:$0xff] (!%p151_p2)  }
   0x9   : > { %819 = vset.pattern.permute.xlu1 (!%p151_p2), %v875_v5  ;;  %820 = vset.pattern.permute.xlu0 (!%p151_p2), %v875_v5  ;;  %v835_v16 = vld [vmem:[%s1105_s1 + $0x70] sm:$0xff] (!%p151_p2)   ;;  %v837_v18 = vld [vmem:[%s1105_s1 + $0x78] sm:$0xff] (!%p151_p2)   ;;  %vm419_vm0 = vcmp.lt.s32.totalorder (!%p151_p2), %v978_v26, 20 }
   0xa   : > { %v836_v17 = vld [vmem:[%s1105_s1 + $0x30] sm:$0xff] (!%p151_p2)   ;;  %v838_v19 = vld [vmem:[%s1105_s1 + $0x38] sm:$0xff] (!%p151_p2)  }
   0xb   : > { %761 = vmatpush3.bf16.msra.mxu0 (!%p151_p2), %v826_v3  ;;  %801 = vmatpush3.bf16.msra.mxu1 (!%p151_p2), %v826_v3 }
   0xc   : > { %762 = vmatprep.subr.bf16.mxu0 (!%p151_p2), %v827_v4  ;;  %794 = vmatprep.subr.bf16.mxu1 (!%p151_p2), %v827_v4 }
   0xd   : > { %s1109_s16 = smov (!%p179_p3, %s178_s16), 9  ;;  %s1111_s13 = smov (!%p191_p4, %s904_s13), 1 }
   0xe   : > { %s757_s4 = sshll.u32 %s1109_s16, 3 }
   0xf   : > { %763 = vmatpush3.bf16.msra.mxu0 %v828_v6  ;;  %802 = vmatpush3.bf16.msra.mxu1 %v828_v6  ;;  %s941_s9 = scalar_lea.vmem %s1104_s0, %s757_s4  ;;  %s952_s18 = scalar_lea.vmem %s1106_s2, %s757_s4  ;;  %v418_v6 = vcvt.s32.f32 %v978_v26 }
  0x10   : > { %764 = vmatprep.subr.bf16.mxu0 %v829_v7  ;;  %795 = vmatprep.subr.bf16.mxu1 %v829_v7  ;;  %v841_v12 = vld [vmem:[%s941_s9 + $0x4] ss:$8 sps:$4 sm:$0xff]   ;;  %v844_v13 = vld [vmem:[%s941_s9 + $0x14] ss:$8 sps:$4 sm:$0xff]   ;;  %v839_v21 = vld [vmem:[%s941_s9] ss:$8 sps:$4 sm:$0xff]   ;;  %s193_s4 = scalar_lea.vmem %s1107_s3, %s1111_s13 }
  0x11   : > { %v960_v15 = vld [vmem:[%s952_s18] sm:$0xff]  ;;  %387 = vmatprep.mubr.bf16.mxu0 %v841_v12  ;;  %395 = vmatprep.mubr.bf16.mxu1 %v844_v13  ;;  %v842_v22 = vld [vmem:[%s941_s9 + $0x10] ss:$8 sps:$4 sm:$0xff]   ;;  %v1015_v52 = vld [vmem:[%s952_s18 + $0x8] sm:$0xff] }
  0x12   : > { %477 = vperm.xlu1 %819, %v960_v15   ;;  %v199_v20 = vld [vmem:[%s941_s9 + $0x20] sm:$0xff]  ;;  %v1004_v49 = vld [vmem:[%s952_s18 + $0x10] sm:$0xff]  ;;  %v1008_v50 = vld [vmem:[%s952_s18 + $0x18] sm:$0xff]  ;;  %vm546_vm11 = vcmp.ge.f32.partialorder %v1015_v52, 0.0  ;;  %vm545_vm12 = vcmp.ge.f32.partialorder %v960_v15, 0.0 }
  0x13   : > { %765 = vmatpush3.bf16.msra.mxu0 %v830_v8  ;;  %803 = vmatpush3.bf16.msra.mxu1 %v830_v8  ;;  %v728_v23 = vcombine.high %v199_v20, %v199_v20  ;;  %v727_v24 = vcombine.low %v199_v20, %v199_v20  ;;  %v1012_v51 = vld [vmem:[%s952_s18 + $0x20] sm:$0xff]  ;;  %vm547_vm14 = vcmp.ge.f32.partialorder %v1004_v49, 0.0 }
  0x14   : > { %766 = vmatprep.subr.bf16.mxu0 %v831_v9  ;;  %796 = vmatprep.subr.bf16.mxu1 %v831_v9 }
  0x17   : > { %767 = vmatpush3.bf16.msra.mxu0 %v832_v10  ;;  %804 = vmatpush3.bf16.msra.mxu1 %v832_v10 }
  0x18   : > { %768 = vmatprep.subr.bf16.mxu0 %v833_v11  ;;  %797 = vmatprep.subr.bf16.mxu1 %v833_v11 }
  0x1b   : > { %769 = vmatpush3.bf16.msra.mxu0 %v834_v14  ;;  %805 = vmatpush3.bf16.msra.mxu1 %v834_v14 }
  0x1c   : > { %770 = vmatprep.subr.bf16.mxu0 %v835_v16  ;;  %798 = vmatprep.subr.bf16.mxu1 %v835_v16 }
  0x1f   : > { %771 = vmatpush3.bf16.msra.mxu0 %v836_v17  ;;  %806 = vmatpush3.bf16.msra.mxu1 %v836_v17 }
  0x20   : > { %772 = vmatprep.subr.bf16.mxu0 %v837_v18  ;;  %799 = vmatprep.subr.bf16.mxu1 %v837_v18 }
  0x23   : > { %773 = vmatpush3.bf16.msra.mxu0 %v838_v19  ;;  %807 = vmatpush3.bf16.msra.mxu1 %v838_v19 }
  0x26   : > { %388 = vmatmul.mubr.bf16.vlgmr.msra.gmra.mrb[0].mxu0 %v839_v21  ;;  %396 = vmatmul.mubr.bf16.vlgmr.msra.gmra.mrb[0].mxu1 %v842_v22 }
  0x27   : > { %403 = vmatprep.mubr.bf16.mxu1 %v728_v23 }
  0x2e   : > { %404 = vmatmul.mubr.bf16.gmra.mrb[4].mxu1 %v727_v24 }
  0x91   : > { %v478_v53 = vpop.permute.xlu1 %477 }
  0x92   : > { %vm500_vm1 = vcmp.eq.f32.partialorder %v418_v6, %v478_v53 }
  0xf9   : > { %v774_v27 = vpop.f32.mrb[0].mxu0  ;;  %v780_v28 = vpop.f32.mrb[0].mxu1 }
  0xfa   : > { %v775_v29 = vpop.f32.mrb[1].mxu0  ;;  %v781_v30 = vpop.f32.mrb[1].mxu1 }
  0xfb   : > { %v776_v31 = vadd.f32 %v775_v29, %v774_v27  ;;  %v782_v32 = vadd.f32 %v781_v30, %v780_v28  ;;  %v777_v33 = vpop.f32.mrb[2].mxu0  ;;  %v783_v34 = vpop.f32.mrb[2].mxu1  ;;  %v876_v28 = vmov 1  }
  0xfc   : > { %v778_v35 = vpop.f32.mrb[3].mxu0  ;;  %v784_v36 = vpop.f32.mrb[3].mxu1 }
  0xfd   : > { %v983_v37 = vsel %vm419_vm0, %v776_v31, -1e+30  ;;  %v987_v38 = vsel %vm419_vm0, %v782_v32, -1e+30  ;;  %v779_v39 = vadd.f32 %v778_v35, %v777_v33  ;;  %v785_v40 = vadd.f32 %v784_v36, %v783_v34 }
  0xfe   : > { %429 = vmax.xlane.f32.xlu1 %v987_v38  ;;  %425 = vmax.xlane.f32.xlu0 %v983_v37  ;;  %v505_v12 = vsel %vm500_vm1, %v983_v37, 0.0  ;;  %v877_v35 = vmov 0.0  }
  0xff   : > { %v993_v41 = vsel %vm419_vm0, %v785_v40, -1e+30  ;;  %v421_v42 = vsel %vm419_vm0, %v779_v39, -1e+30  ;;  %v746_v36 = vsel %vm546_vm11, 1.0, %v877_v35  ;;  %v745_v39 = vsel %vm545_vm12, 1.0, %v877_v35 }
 0x100   : > { %v618_v40 = vsel %vm601_vm13, %v746_v36, 0.0 }
 0x101   : > { %v786_v43 = vpop.f32.mrb[4].mxu1 }
 0x102   : > { %v787_v44 = vpop.f32.mrb[5].mxu1  ;;  %431 = vmax.xlane.f32.xlu1 %v993_v41  ;;  %427 = vmax.xlane.f32.xlu0 %v421_v42 }
 0x103   : > { %v788_v45 = vadd.f32 %v787_v44, %v786_v43  ;;  %v789_v46 = vpop.f32.mrb[6].mxu1  ;;  %v747_v43 = vsel %vm547_vm14, 1.0, %v877_v35 }
 0x104   : > { %v790_v47 = vpop.f32.mrb[7].mxu1 }
 0x105   : > { %v1000_v48 = vsel %vm419_vm0, %v788_v45, -1e+30  ;;  %v620_v45 = vsel %vm601_vm13, %v747_v43, 0.0  ;;  %vm548_vm0 = vcmp.ge.f32.partialorder %v1008_v50, 0.0 }
 0x106   : > { %433 = vmax.xlane.f32.xlu0 %v1000_v48 }
 0x113   : > { %487 = vperm.xlu1 %819, %v1004_v49  }
 0x117   : > { %492 = vperm.xlu1 %819, %v1008_v50  }
 0x11b   : > { %497 = vperm.xlu1 %819, %v1012_v51  }
 0x11c   : > { %482 = vperm.xlu0 %820, %v1015_v52  }
 0x11f   : > { %821 = vset.pattern.permute.xlu1 %v876_v28 }
 0x18b   : > { %v1019_v54 = vpop.xlane.xlu1 %429  ;;  %v1021_v55 = vpop.xlane.xlu0 %425 }
 0x18c   : > { %v437_v56 = vsub.f32 %v987_v38, %v1019_v54  ;;  %v435_v57 = vsub.f32 %v983_v37, %v1021_v55  ;;  %vm527_vm4 = vcmp.eq.f32.partialorder %v987_v38, %v1019_v54  ;;  %vm525_vm6 = vcmp.eq.f32.partialorder %v983_v37, %v1021_v55 }
 0x18d   : > { %v532_v18 = vsel %vm527_vm4, %v418_v6, 128.0  ;;  %v530_v21 = vsel %vm525_vm6, %v418_v6, 128.0  ;;  %vm585_vm6 = vcmask 15368  }
 0x18e   : > { %v440_v58 = vmul.f32 1.442695, %v435_v57  ;;  %v444_v60 = vmul.f32 1.442695, %v437_v56 }
 0x18f   : > { %v1027_v59 = vpop.xlane.xlu0 %427  ;;  %v1030_v62 = vpop.xlane.xlu1 %431 }
 0x190   : > { %v436_v61 = vsub.f32 %v421_v42, %v1027_v59  ;;  %847 = vpow2.f32 %v440_v58  ;;  %v438_v0 = vsub.f32 %v993_v41, %v1030_v62  ;;  %vm526_vm3 = vcmp.eq.f32.partialorder %v421_v42, %v1027_v59 }
 0x191   : > { %849 = vpow2.f32 %v444_v60  ;;  %v531_v14 = vsel %vm526_vm3, %v418_v6, 128.0  ;;  %vm528_vm5 = vcmp.eq.f32.partialorder %v993_v41, %v1030_v62 }
 0x192   : > { %v442_v63 = vmul.f32 1.442695, %v436_v61  ;;  %v446_v2 = vmul.f32 1.442695, %v438_v0  ;;  %v533_v20 = vsel %vm528_vm5, %v418_v6, 128.0  ;;  %v748_v61 = vsel %vm548_vm0, 1.0, %v877_v35 }
 0x193   : > { %v1034_v1 = vpop.xlane.xlu0 %433  ;;  %v488_v16 = vpop.permute.xlu1 %487 }
 0x194   : > { %851 = vpow2.f32 %v442_v63  ;;  %v439_v3 = vsub.f32 %v1000_v48, %v1034_v1  ;;  %vm502_vm7 = vcmp.eq.f32.partialorder %v418_v6, %v488_v16  ;;  %vm529_vm8 = vcmp.eq.f32.partialorder %v1000_v48, %v1034_v1 }
 0x195   : > { %853 = vpow2.f32 %v446_v2  ;;  %v534_v22 = vsel %vm529_vm8, %v418_v6, 128.0  ;;  %v507_v23 = vsel %vm502_vm7, %v987_v38, 0.0  ;;  %vm632_vm7 = vcmp.eq.s32.totalorder %v978_v26, 0 }
 0x196   : > { %v448_v7 = vmul.f32 1.442695, %v439_v3  ;;  %vm639_vm8 = vcmp.eq.s32.totalorder %v978_v26, 1 }
 0x197   : > { %v493_v19 = vpop.permute.xlu1 %492 }
 0x198   : > { %855 = vpow2.f32 %v448_v7  ;;  %vm503_vm9 = vcmp.eq.f32.partialorder %v418_v6, %v493_v19 }
 0x199   : > { %v508_v25 = vsel %vm503_vm9, %v993_v41, 0.0  ;;  %v617_v41 = vsel %vm601_vm13, %v745_v39, 0.0  ;;  %vm647_vm9 = vcmp.eq.s32.totalorder %v978_v26, 2 }
 0x19a   : > { %v848_v4 = vpop.eup %847 }
 0x19b   : > { %450 = vadd.xlane.f32.xlu1 %v848_v4  ;;  %v483_v8 = vpop.permute.xlu0 %482  ;;  %v850_v9 = vpop.eup %849 }
 0x19c   : > { %vm501_vm2 = vcmp.eq.f32.partialorder %v418_v6, %v483_v8  ;;  %v498_v24 = vpop.permute.xlu1 %497  ;;  %v622_v8 = vsel %vm601_vm13, %v748_v61, 0.0 }
 0x19d   : > { %v506_v11 = vsel %vm501_vm2, %v421_v42, 0.0  ;;  %vm504_vm10 = vcmp.eq.f32.partialorder %v418_v6, %v498_v24  ;;  %vm549_vm2 = vcmp.ge.f32.partialorder %v1012_v51, 0.0 }
 0x19e   : > { %v852_v10 = vpop.eup %851  ;;  %v509_v27 = vsel %vm504_vm10, %v1000_v48, 0.0  ;;  %v619_v48 = vadd.f32 %v618_v40, %v617_v41 }
 0x19f   : > { %454 = vadd.xlane.f32.xlu1 %v850_v9  ;;  %452 = vadd.xlane.f32.xlu0 %v852_v10  ;;  %v854_v13 = vpop.eup %853 }
 0x1a0   : > { %v621_v4 = vadd.f32 %v620_v45, %v619_v48 }
 0x1a2   : > { %v856_v17 = vpop.eup %855 }
 0x1a3   : > { %512 = vadd.xlane.f32.xlu0 %v506_v11  ;;  %510 = vadd.xlane.f32.xlu1 %v505_v12 }
 0x1a7   : > { %537 = vmin.xlane.f32.xlu0 %v531_v14  ;;  %456 = vadd.xlane.f32.xlu1 %v854_v13  ;;  %v749_v13 = vsel %vm549_vm2, 1.0, %v877_v35 }
 0x1ab   : > { %539 = vmin.xlane.f32.xlu0 %v532_v18  ;;  %458 = vadd.xlane.f32.xlu1 %v856_v17  ;;  %v623_v17 = vadd.f32 %v622_v8, %v621_v4 }
 0x1af   : > { %541 = vmin.xlane.f32.xlu0 %v533_v20  ;;  %535 = vmin.xlane.f32.xlu1 %v530_v21 }
 0x1b3   : > { %543 = vmin.xlane.f32.xlu0 %v534_v22  ;;  %514 = vadd.xlane.f32.xlu1 %v507_v23 }
 0x1b7   : > { %516 = vadd.xlane.f32.xlu1 %v508_v25  ;;  %v624_v25 = vsel %vm601_vm13, %v749_v13, 0.0 }
 0x1bb   : > { %518 = vadd.xlane.f32.xlu1 %v509_v27 }
 0x228   : > { %v451_v29 = vpop.xlane.xlu1 %450 }
 0x229   : > { %857 = vlog2.f32 %v451_v29 }
 0x22c   : > { %v455_v30 = vpop.xlane.xlu1 %454  ;;  %v453_v31 = vpop.xlane.xlu0 %452 }
 0x22d   : > { %859 = vlog2.f32 %v453_v31 }
 0x22e   : > { %861 = vlog2.f32 %v455_v30 }
 0x230   : > { %v513_v32 = vpop.xlane.xlu0 %512  ;;  %v1052_v33 = vpop.xlane.xlu1 %510 }
 0x233   : > { %v858_v34 = vpop.eup %857 }
 0x234   : > { %v538_v37 = vpop.xlane.xlu0 %537  ;;  %v457_v38 = vpop.xlane.xlu1 %456  ;;  %v461_v42 = vmul.f32 0.6931472, %v858_v34 }
 0x235   : > { %863 = vlog2.f32 %v457_v38  ;;  %vm561_vm15 = vcmp.eq.f32.partialorder %v538_v37, %v1015_v52 }
 0x236   : > { %v751_v57 = vsel %vm561_vm15, 1.0, %v877_v35  ;;  %v470_v60 = vadd.f32 %v461_v42, %v1021_v55 }
 0x237   : > { %v860_v44 = vpop.eup %859  ;;  %v576_v0 = vmul.f32 %v751_v57, %v746_v36 }
 0x238   : > { %v540_v46 = vpop.xlane.xlu0 %539  ;;  %v459_v47 = vpop.xlane.xlu1 %458  ;;  %v463_v56 = vmul.f32 0.6931472, %v860_v44  ;;  %v520_v55 = vsub.f32 %v470_v60, %v1052_v33 }
 0x239   : > { %v862_v53 = vpop.eup %861  ;;  %vm562_vm1 = vcmp.eq.f32.partialorder %v540_v46, %v1004_v49  ;;  %865 = vlog2.f32 %v459_v47  ;;  %v603_v14 = vsel %vm601_vm13, %v576_v0, 0.0 }
 0x23a   : > { %v471_v58 = vadd.f32 %v463_v56, %v1027_v59  ;;  %v465_v63 = vmul.f32 0.6931472, %v862_v53  ;;  %v752_v2 = vsel %vm562_vm1, 1.0, %v877_v35  ;;  %v580_v30 = vmul.f32 %v520_v55, %v960_v15 }
 0x23b   : > { %v577_v11 = vmul.f32 %v752_v2, %v747_v43 }
 0x23c   : > { %v542_v3 = vpop.xlane.xlu0 %541  ;;  %v536_v6 = vpop.xlane.xlu1 %535  ;;  %v521_v7 = vsub.f32 %v471_v58, %v513_v32  ;;  %v472_v19 = vadd.f32 %v465_v63, %v1019_v54  ;;  %v586_v41 = vsel %vm585_vm6, %v580_v30, 0.0 }
 0x23d   : > { %vm563_vm3 = vcmp.eq.f32.partialorder %v542_v3, %v1008_v50  ;;  %vm560_vm4 = vcmp.eq.f32.partialorder %v536_v6, %v960_v15  ;;  %v605_v31 = vsel %vm601_vm13, %v577_v11, 0.0 }
 0x23e   : > { %v753_v9 = vsel %vm563_vm3, 1.0, %v877_v35  ;;  %v750_v59 = vsel %vm560_vm4, 1.0, %v877_v35  ;;  %v581_v21 = vmul.f32 %v521_v7, %v1015_v52 }
 0x23f   : > { %v864_v10 = vpop.eup %863  ;;  %v575_v12 = vmul.f32 %v750_v59, %v745_v39  ;;  %v578_v22 = vmul.f32 %v753_v9, %v748_v61 }
 0x240   : > { %v467_v16 = vmul.f32 0.6931472, %v864_v10  ;;  %v544_v18 = vpop.xlane.xlu0 %543  ;;  %v515_v20 = vpop.xlane.xlu1 %514  ;;  %v587_v37 = vsel %vm585_vm6, %v581_v21, 0.0 }
 0x241   : > { %v602_v23 = vsel %vm601_vm13, %v575_v12, 0.0  ;;  %vm564_vm5 = vcmp.eq.f32.partialorder %v544_v18, %v1012_v51  ;;  %v522_v28 = vsub.f32 %v472_v19, %v515_v20  ;;  %v607_v38 = vsel %vm601_vm13, %v578_v22, 0.0 }
 0x242   : > { %v604_v24 = vadd.f32 %v603_v14, %v602_v23  ;;  %v754_v27 = vsel %vm564_vm5, 1.0, %v877_v35  ;;  %v473_v54 = vadd.f32 %v467_v16, %v1030_v62  ;;  %v625_v35 = vadd.f32 %v624_v25, %v623_v17 }
 0x243   : > { %v866_v29 = vpop.eup %865  ;;  %v579_v32 = vmul.f32 %v754_v27, %v749_v13  ;;  %v582_v34 = vmul.f32 %v522_v28, %v1004_v49  ;;  %v588_v44 = vadd.f32 %v587_v37, %v586_v41 }
 0x244   : > { %v469_v52 = vmul.f32 0.6931472, %v866_v29  ;;  %v606_v33 = vadd.f32 %v605_v31, %v604_v24  ;;  %v517_v36 = vpop.xlane.xlu1 %516  ;;  %v626_v46 = vrot.slane %v625_v35, 4 }
 0x245   : > { %v523_v39 = vsub.f32 %v473_v54, %v517_v36  ;;  %v609_v42 = vsel %vm601_vm13, %v579_v32, 0.0  ;;  %v589_v62 = vsel %vm585_vm6, %v582_v34, 0.0 }
 0x246   : > { %v608_v40 = vadd.f32 %v607_v38, %v606_v33  ;;  %v474_v15 = vadd.f32 %v469_v52, %v1034_v1  ;;  %v590_v56 = vadd.f32 %v589_v62, %v588_v44  ;;  %v627_v60 = vadd.f32 %v626_v46, %v625_v35 }
 0x247   : > { %v583_v43 = vmul.f32 %v523_v39, %v1008_v50 }
 0x248   : > { %v610_v49 = vadd.f32 %v609_v42, %v608_v40  ;;  %v519_v45 = vpop.xlane.xlu1 %518  ;;  %v628_v3 = vrot.slane %v627_v60, 2 }
 0x249   : > { %v591_v47 = vsel %vm585_vm6, %v583_v43, 0.0  ;;  %v524_v48 = vsub.f32 %v474_v15, %v519_v45 }
 0x24a   : > { %v611_v53 = vrot.slane %v610_v49, 4  ;;  %v592_v58 = vadd.f32 %v591_v47, %v590_v56  ;;  %v629_v9 = vadd.f32 %v628_v3, %v627_v60 }
 0x24b   : > { %v584_v57 = vmul.f32 %v524_v48, %v1012_v51 }
 0x24c   : > { %v612_v1 = vadd.f32 %v611_v53, %v610_v49  ;;  %v630_v10 = vrot.slane %v629_v9, 1 }
 0x24d   : > { %v593_v61 = vsel %vm585_vm6, %v584_v57, 0.0 }
 0x24e   : > { %v594_v63 = vadd.f32 %v593_v61, %v592_v58  ;;  %v613_v0 = vrot.slane %v612_v1, 2  ;;  %v631_v11 = vadd.f32 %v630_v10, %v629_v9 }
 0x250   : > { %v595_v2 = vrot.slane %v594_v63, 4  ;;  %v614_v50 = vadd.f32 %v613_v0, %v612_v1 }
 0x252   : > { %v596_v4 = vadd.f32 %v595_v2, %v594_v63  ;;  %v615_v6 = vrot.slane %v614_v50, 1 }
 0x254   : > { %v616_v7 = vadd.f32 %v615_v6, %v614_v50  ;;  %v597_v8 = vrot.slane %v596_v4, 2 }
 0x256   : > { %642 = vperm.xlu0 %820, %v616_v7   ;;  %v598_v59 = vadd.f32 %v597_v8, %v596_v4 }
 0x258   : > { %v599_v51 = vrot.slane %v598_v59, 1 }
 0x25a   : > { %v600_v55 = vadd.f32 %v599_v51, %v598_v59 }
 0x25c   : > { %635 = vperm.xlu1 %821, %v600_v55  }
 0x260   : > { %822 = vset.pattern.permute.xlu1 %v875_v5 }
 0x261   : > { %650 = vperm.xlu1 %822, %v631_v11  }
 0x2d5   : > { %v643_v13 = vpop.permute.xlu0 %642 }
 0x2d6   : > { %v645_v16 = vsel %vm639_vm8, %v643_v13, 0.0 }
 0x2db   : > { %v636_v12 = vpop.permute.xlu1 %635 }
 0x2dc   : > { %v638_v14 = vsel %vm632_vm7, %v636_v12, 0.0 }
 0x2dd   : > { %v646_v17 = vadd.f32 %v645_v16, %v638_v14 }
 0x2e0   : > { %v651_v18 = vpop.permute.xlu1 %650 }
 0x2e1   : > { %v653_v5 = vsel %vm647_vm9, %v651_v18, 0.0 }
 0x2e2   : > { %v654_v19 = vadd.f32 %v653_v5, %v646_v17 }
 0x2e4   : > { %655 = vst [vmem:[%s193_s4] sm:$0x1] %v654_v19 }
 0x2e5 PF: > { %s13_s12 = sadd.s32 1, %s873_s12  }
 0x2e6   : > { %p10_p5 = scmp.ge.s32.totalorder %s13_s12, 4  }
 0x2e8   :  { %12 = sbr.rel (!%p10_p5) target bundleno = 1 (0x1), region = 65 }

</bundles_post_ra>
